<compile_context>
chip_gen: v6e
topology: v6e:2x2x1
jax: 0.10.0
libtpu: 0.0.40
codegen_flags: <defaults>
</compile_context>

<pallas_src>
import jax
import jax.numpy as jnp
from jax.experimental import pallas as pl
from jax.experimental.pallas import tpu as pltpu


def _soft_xent_kernel(logits_ref, targets_ref, out_ref, acc_ref):
    """One grid step processes a (TILE_N, C) block of rows.

    Grid = (n_par, tiles_per_chunk):
      axis 0 ("parallel")  : independent batch chunks (megacore split on v7x)
      axis 1 ("arbitrary") : reduction over row tiles within a chunk

    acc_ref : (TILE_N, 1) f32 per-row partial sums, resident across axis 1.
    out_ref : (1, 1, 1)   f32 partial sum for this chunk, written on the last step.
    """
    j = pl.program_id(1)

    @pl.when(j == 0)
    def _():
        acc_ref[...] = jnp.zeros_like(acc_ref)

    x = logits_ref[...].astype(jnp.float32)   # (TILE_N, C)
    t = targets_ref[...].astype(jnp.float32)  # (TILE_N, C)

    # Numerically-stable:  sum_c t * log_softmax(x)
    #   = sum_c t*(x - m) - log(sum_c exp(x - m)) * sum_c t
    m = jnp.max(x, axis=1, keepdims=True)                              # (TILE_N, 1)
    shifted = x - m                                                    # (TILE_N, C)
    lse = jnp.log(jnp.sum(jnp.exp(shifted), axis=1, keepdims=True))    # (TILE_N, 1)
    t_dot = jnp.sum(t * shifted, axis=1, keepdims=True)                # (TILE_N, 1)
    t_sum = jnp.sum(t, axis=1, keepdims=True)                          # (TILE_N, 1)

    acc_ref[...] += t_dot - lse * t_sum

    @pl.when(j == pl.num_programs(1) - 1)
    def _():
        out_ref[...] = jnp.reshape(jnp.sum(acc_ref[...]), (1, 1, 1))


def _vmem_capacity_bytes():
    """Best-effort per-TensorCore VMEM capacity; conservative (v7x) fallback."""
    try:
        info = pltpu.get_tpu_info()
        cap = getattr(info, "vmem_capacity_bytes", None)
        if cap:
            return int(cap)
    except Exception:
        pass
    return 64 * 1024 * 1024


def _pick_tile_n(n, c, itemsize, vmem_budget_bytes):
    """Largest row tile whose estimated VMEM footprint fits the budget."""
    # 2 inputs x 2 pipeline buffers (input dtype) + ~3 full-width f32 temporaries
    # + lane-padded (TILE_N, 1) f32 accumulator.
    per_row = c * (4 * itemsize + 3 * 4) + 128 * 4
    tile = int(vmem_budget_bytes // max(per_row, 1))
    mult = 16 if itemsize < 4 else 8       # bf16 min sublane tile is (16, 128)
    tile = min(tile, 8192)                 # beyond this, per-step overhead is negligible
    tile = min(tile, -(-n // mult) * mult)  # never exceed (padded) batch
    tile = max(mult, (tile // mult) * mult)
    return int(tile)


def soft_cross_entropy_loss(logits, targets, *, tile_n=None):
    """Pallas TPU implementation of SoftCrossEntropyLoss.forward.

    logits, targets: (N, C). Returns a scalar float32.
    """
    n, c = logits.shape
    assert targets.shape == (n, c)

    itemsize = jnp.dtype(logits.dtype).itemsize
    vmem_cap = _vmem_capacity_bytes()
    # Request a scoped-VMEM limit well above the defaults (16/32 MiB) but with
    # headroom below physical capacity (128 MiB v5e/v6e, 64 MiB per TC on v7x).
    vmem_limit = int(min(vmem_cap * 3 // 4, 96 * 1024 * 1024))

    if tile_n is None:
        tile_n = _pick_tile_n(n, c, itemsize, vmem_limit // 2)
    else:
        mult = 16 if itemsize < 4 else 8
        tile_n = max(mult, (int(tile_n) // mult) * mult)

    n_tiles = pl.cdiv(n, tile_n)
    n_par = 2 if n_tiles >= 2 else 1          # one chunk per TensorCore on v7x
    tiles_per_chunk = pl.cdiv(n_tiles, n_par)
    padded_n = n_par * tiles_per_chunk * tile_n

    if padded_n != n:
        pad = ((0, padded_n - n), (0, 0))
        # Zero-padded target rows contribute exactly 0 to the accumulated sum.
        logits = jnp.pad(logits, pad)
        targets = jnp.pad(targets, pad)

    partials = pl.pallas_call(
        _soft_xent_kernel,
        out_shape=jax.ShapeDtypeStruct((n_par, 1, 1), jnp.float32),
        grid_spec=pltpu.PrefetchScalarGridSpec(
            num_scalar_prefetch=0,
            grid=(n_par, tiles_per_chunk),
            in_specs=[
                pl.BlockSpec((tile_n, c), lambda i, j: (i * tiles_per_chunk + j, 0)),
                pl.BlockSpec((tile_n, c), lambda i, j: (i * tiles_per_chunk + j, 0)),
            ],
            out_specs=pl.BlockSpec((1, 1, 1), lambda i, j: (i, 0, 0)),
            scratch_shapes=[pltpu.VMEM((tile_n, 1), jnp.float32)],
        ),
        compiler_params=pltpu.CompilerParams(
            dimension_semantics=("parallel", "arbitrary"),
            vmem_limit_bytes=vmem_limit,
        ),
    )(logits, targets)

    # Mean over the ORIGINAL batch size, times -1 (matches the torch module).
    return -jnp.sum(partials) / jnp.float32(n)


def _reference(logits, targets):
    lsm = jax.nn.log_softmax(logits.astype(jnp.float32), axis=1)
    return -(targets.astype(jnp.float32) * lsm).sum(1).mean()


if __name__ == "__main__":
    key = jax.random.PRNGKey(0)
    k1, k2, k3, k4 = jax.random.split(key, 4)

    # Small demo shapes (auto tile path, single chunk).
    N, C = 16, 32
    logits = jax.random.normal(k1, (N, C), dtype=jnp.float32)
    targets = jax.nn.softmax(jax.random.normal(k2, (N, C), dtype=jnp.float32), axis=1)

    loss = soft_cross_entropy_loss(logits, targets)
    jax.block_until_ready(loss)
    ref = _reference(logits, targets)
    assert jnp.allclose(loss, ref, atol=1e-5, rtol=1e-5), (loss, ref)

    # Exercise the multi-tile path: ragged batch, parallel chunks, reduction axis.
    N2, C2 = 50, 32
    logits2 = jax.random.normal(k3, (N2, C2), dtype=jnp.float32)
    targets2 = jax.nn.softmax(jax.random.normal(k4, (N2, C2), dtype=jnp.float32), axis=1)

    loss2 = soft_cross_entropy_loss(logits2, targets2, tile_n=8)
    jax.block_until_ready(loss2)
    ref2 = _reference(logits2, targets2)
    assert jnp.allclose(loss2, ref2, atol=1e-5, rtol=1e-5), (loss2, ref2)

    print("KERNEL_OK")
</pallas_src>

<mosaic_0001>
module attributes {stable_mosaic.version = 11 : i64} {
  func.func @_soft_xent_kernel(%arg0: i32, %arg1: i32, %arg2: memref<16x32xf32, #tpu.memory_space<vmem>>, %arg3: memref<16x32xf32, #tpu.memory_space<vmem>>, %arg4: memref<1x1x1xf32, #tpu.memory_space<vmem>>, %arg5: memref<16x1xf32, #tpu.memory_space<vmem>>) attributes {dimension_semantics = [#tpu.dimension_semantics<parallel>, #tpu.dimension_semantics<arbitrary>], iteration_bounds = array<i64: 1, 1>, scalar_prefetch = 0 : i64, scratch_operands = 1 : i64, tpu.core_type = #tpu.core_type<tc>, window_params = [{transform_indices = @transform_0, window_bounds = array<i64: 16, 32>}, {transform_indices = @transform_1, window_bounds = array<i64: 16, 32>}, {transform_indices = @transform_2, window_bounds = array<i64: 1, 1, 1>}]} {
    %c0_i32 = arith.constant 0 : i32
    %0 = arith.cmpi eq, %arg1, %c0_i32 : i32
    %1 = arith.extui %0 : i1 to i32
    %c0_i32_0 = arith.constant 0 : i32
    %2 = arith.cmpi ne, %1, %c0_i32_0 : i32
    scf.if %2 {
      %cst_13 = arith.constant 0.000000e+00 : f32
      %26 = vector.broadcast %cst_13 : f32 to vector<16x1xf32>
      %c0_14 = arith.constant 0 : index
      %c0_15 = arith.constant 0 : index
      %27 = vector.load %arg5[%c0_14, %c0_15] : memref<16x1xf32, #tpu.memory_space<vmem>>, vector<16x1xf32>
      tpu.vector_store %arg5[%c0_14, %c0_15], %26 {strides = array<i32>} : memref<16x1xf32, #tpu.memory_space<vmem>>, vector<16x1xf32>,
    } else {
    }
    %c0 = arith.constant 0 : index
    %c0_1 = arith.constant 0 : index
    %3 = vector.load %arg2[%c0, %c0_1] : memref<16x32xf32, #tpu.memory_space<vmem>>, vector<16x32xf32>
    %c0_2 = arith.constant 0 : index
    %c0_3 = arith.constant 0 : index
    %4 = vector.load %arg3[%c0_2, %c0_3] : memref<16x32xf32, #tpu.memory_space<vmem>>, vector<16x32xf32>
    %cst = arith.constant dense<0xFF800000> : vector<16xf32>
    %5 = vector.multi_reduction <maximumf>, %3, %cst [1] : vector<16x32xf32> to vector<16xf32>
    %6 = vector.shape_cast %5 : vector<16xf32> to vector<16x1xf32>
    %7 = vector.broadcast %6 : vector<16x1xf32> to vector<16x32xf32>
    %8 = arith.subf %3, %7 : vector<16x32xf32>
    %9 = math.exp %8 : vector<16x32xf32>
    %cst_4 = arith.constant dense<0.000000e+00> : vector<16xf32>
    %10 = vector.multi_reduction <add>, %9, %cst_4 [1] : vector<16x32xf32> to vector<16xf32>
    %11 = vector.shape_cast %10 : vector<16xf32> to vector<16x1xf32>
    %12 = math.log %11 : vector<16x1xf32>
    %13 = arith.mulf %4, %8 : vector<16x32xf32>
    %cst_5 = arith.constant dense<0.000000e+00> : vector<16xf32>
    %14 = vector.multi_reduction <add>, %13, %cst_5 [1] : vector<16x32xf32> to vector<16xf32>
    %15 = vector.shape_cast %14 : vector<16xf32> to vector<16x1xf32>
    %cst_6 = arith.constant dense<0.000000e+00> : vector<16xf32>
    %16 = vector.multi_reduction <add>, %4, %cst_6 [1] : vector<16x32xf32> to vector<16xf32>
    %17 = vector.shape_cast %16 : vector<16xf32> to vector<16x1xf32>
    %c0_7 = arith.constant 0 : index
    %c0_8 = arith.constant 0 : index
    %18 = vector.load %arg5[%c0_7, %c0_8] : memref<16x1xf32, #tpu.memory_space<vmem>>, vector<16x1xf32>
    %19 = arith.mulf %12, %17 : vector<16x1xf32>
    %20 = arith.subf %15, %19 : vector<16x1xf32>
    %21 = arith.addf %18, %20 : vector<16x1xf32>
    %c0_9 = arith.constant 0 : index
    %c0_10 = arith.constant 0 : index
    %22 = vector.load %arg5[%c0_9, %c0_10] : memref<16x1xf32, #tpu.memory_space<vmem>>, vector<16x1xf32>
    tpu.vector_store %arg5[%c0_9, %c0_10], %21 {strides = array<i32>} : memref<16x1xf32, #tpu.memory_space<vmem>>, vector<16x1xf32>,
    %c0_i32_11 = arith.constant 0 : i32
    %23 = arith.cmpi eq, %arg1, %c0_i32_11 : i32
    %24 = arith.extui %23 : i1 to i32
    %c0_i32_12 = arith.constant 0 : i32
    %25 = arith.cmpi ne, %24, %c0_i32_12 : i32
    scf.if %25 {
      %c0_13 = arith.constant 0 : index
      %c0_14 = arith.constant 0 : index
      %26 = vector.load %arg5[%c0_13, %c0_14] : memref<16x1xf32, #tpu.memory_space<vmem>>, vector<16x1xf32>
      %27 = vector.shape_cast %26 : vector<16x1xf32> to vector<1x16x1xf32>
      %cst_15 = arith.constant dense<0.000000e+00> : vector<1xf32>
      %28 = vector.multi_reduction <add>, %27, %cst_15 [1, 2] : vector<1x16x1xf32> to vector<1xf32>
      %29 = vector.shape_cast %28 : vector<1xf32> to vector<1x1x1xf32>
      %30 = vector.extract %29[0, 0, 0] : f32 from vector<1x1x1xf32>
      %31 = vector.broadcast %30 : f32 to vector<1x1x1xf32>
      %c0_16 = arith.constant 0 : index
      %c0_17 = arith.constant 0 : index
      %c0_18 = arith.constant 0 : index
      %32 = vector.load %arg4[%c0_16, %c0_17, %c0_18] : memref<1x1x1xf32, #tpu.memory_space<vmem>>, vector<1x1x1xf32>
      tpu.vector_store %arg4[%c0_16, %c0_17, %c0_18], %31 {strides = array<i32>} : memref<1x1x1xf32, #tpu.memory_space<vmem>>, vector<1x1x1xf32>,
    } else {
    }
    return
  }
  func.func @transform_0(%arg0: i32, %arg1: i32) -> (i32, i32) {
    %c1_i32 = arith.constant 1 : i32
    %0 = arith.muli %arg0, %c1_i32 : i32
    %1 = arith.addi %0, %arg1 : i32
    %c0_i32 = arith.constant 0 : i32
    %c0_i32_0 = arith.constant 0 : i32
    return %1, %c0_i32 : i32, i32
  }
  func.func @transform_1(%arg0: i32, %arg1: i32) -> (i32, i32) {
    %c1_i32 = arith.constant 1 : i32
    %0 = arith.muli %arg0, %c1_i32 : i32
    %1 = arith.addi %0, %arg1 : i32
    %c0_i32 = arith.constant 0 : i32
    %c0_i32_0 = arith.constant 0 : i32
    return %1, %c0_i32 : i32, i32
  }
  func.func @transform_2(%arg0: i32, %arg1: i32) -> (i32, i32, i32) {
    %c0_i32 = arith.constant 0 : i32
    %c0_i32_0 = arith.constant 0 : i32
    %c0_i32_1 = arith.constant 0 : i32
    return %arg0, %c0_i32, %c0_i32_0 : i32, i32, i32
  }
}

</mosaic_0001>

<bundles_post_ra>
// kernel: tpu_custom_call.1
= control target key start
LH: loop header
LB: loop body
LE: loop exit
PB: predicated region body
PF: predicated region fallthrough
CT: control target
= control target key end

     0   :  { %7 = vsyncpa [#allocation4], 0  ;;  %s273_s0 = inlined_call_operand.hbm [shape: f32[16,32], index: 0, kind: input, shape index: {}]   ;;  %s274_s1 = inlined_call_operand.hbm [shape: f32[16,32], index: 1, kind: input, shape index: {}]   ;;  %s275_s2 = inlined_call_operand.hbm [shape: f32[1,1,1], index: 2, kind: output, shape index: {}]  }
   0x1   :  { %8 = vsyncpa [#allocation7], 0 }
   0x2   :  { %9 = vsyncpa [#allocation5], 0  ;;  %s229_s9 = smov [#allocation3]  }
   0x3   :  { %s19_s10 = sshll.u32 %s229_s9, 4  ;;  %s20_s10 = int_to_ptr.vmem [resolvable:$true] %s19_s10 }
   0x4   :  { %s171_s11 = scalar_lea.vmem %s20_s10, 256  ;;  %p176_p1 = scmp.lt.s32.totalorder %s20_s10, %s20_s10 }
   0x5   :  { %p172_p0 = scmp.ne.s32.totalorder %s20_s10, %s171_s11  ;;  %p177_p2 = scmp.lt.s32.totalorder %s171_s11, %s171_s11 }
   0x7   :  { %p178_p3 = por %p177_p2, %p176_p1 }
   0x9   :  { %p179_p4 = pnand %p178_p3, %p172_p0 }
   0xb   :  { %182 = shalt.err (!%p179_p4)
}
   0xc   :  { %s230_s12 = smov 128   ;;  %s231_s13 = smov 8  }
   0xd   :  { %25 = dma.hbm_to_vmem [thread:$0]  %s273_s0, 256, %s20_s10, [#allocation4], %s230_s12, %s230_s12, %s231_s13  }
   0xe   :  { %s232_s16 = smov [#allocation6]  }
   0xf   :  { %s35_s17 = sshll.u32 %s232_s16, 4  ;;  %s36_s17 = int_to_ptr.vmem [resolvable:$true] %s35_s17 }
  0x10   :  { %s191_s18 = scalar_lea.vmem %s36_s17, 256  ;;  %p196_p6 = scmp.lt.s32.totalorder %s36_s17, %s36_s17 }
  0x11   :  { %p192_p5 = scmp.ne.s32.totalorder %s36_s17, %s191_s18  ;;  %p197_p7 = scmp.lt.s32.totalorder %s191_s18, %s191_s18 }
  0x13   :  { %p198_p8 = por %p197_p7, %p196_p6 }
  0x15   :  { %p199_p9 = pnand %p198_p8, %p192_p5 }
  0x17   :  { %202 = shalt.err (!%p199_p9)
}
  0x18   :  { %41 = dma.hbm_to_vmem [thread:$0]  %s274_s1, 256, %s36_s17, [#allocation7], %s230_s12, %s230_s12, %s231_s13  }
  0x19   :  { %223 = dma.done.wait [#allocation4], 256  }
  0x1a   :  { %224 = vsyncadd [#allocation4], 4294967040 }
  0x1b   :  { %225 = dma.done.wait [#allocation7], 256  }
  0x1c   :  { %226 = vsyncadd [#allocation7], 4294967040  ;;  %vm63_vm0 = vcmask 261120   ;;  %v59_v0 = vld [vmem:[#allocation3] sm:$0xff]  ;;  %v60_v1 = vld [vmem:[#allocation3 + $0x8] sm:$0xff]  ;;  %vm56_vm1 = vcmask 7168  }
  0x1d   :  { %v64_v2 = vsel %vm63_vm0, %v59_v0, -inf  ;;  %v67_v3 = vsel %vm63_vm0, %v60_v1, -inf  ;;  %v61_v4 = vld [vmem:[#allocation6] sm:$0xff]  ;;  %v233_v14 = vmov 0.0   ;;  %v62_v19 = vld [vmem:[#allocation6 + $0x8] sm:$0xff]  ;;  %s234_s0 = smov [#allocation8]  }
  0x1e   :  { %65 = vmax.xlane.f32.xlu0 %v64_v2  ;;  %v94_v5 = vsel %vm63_vm0, %v61_v4, 0.0  ;;  %57 = vst.msk [vmem:[#allocation2] sm:$0xff] %vm56_vm1, %v233_v14  ;;  %58 = vst.msk [vmem:[#allocation2 + $0x8] sm:$0xff] %vm56_vm1, %v233_v14  ;;  %v97_v20 = vsel %vm63_vm0, %v62_v19, 0.0  ;;  %s137_s1 = sshll.u32 %s234_s0, 4  ;;  %vm129_vm2 = vcmask 0   ;;  %s138_s1 = int_to_ptr.vmem [resolvable:$true] %s137_s1 }
  0x1f   :  { %s203_s22 = scalar_lea.vmem %s138_s1, 16  ;;  %s207_s23 = scalar_lea.vmem %s138_s1, 32 }
  0x20   :  { %p204_p10 = scmp.ne.s32.totalorder %s138_s1, %s203_s22  ;;  %p208_p11 = scmp.lt.s32.totalorder %s138_s1, %s138_s1 }
  0x21   :  { %p209_p12 = scmp.lt.s32.totalorder %s207_s23, %s203_s22 }
  0x22   :  { %68 = vmax.xlane.f32.xlu0 %v67_v3 }
  0x23   :  { %p210_p13 = por %p209_p12, %p208_p11 }
  0x25   :  { %v100_v32 = vld [vmem:[#allocation2] sm:$0xff]  ;;  %v101_v38 = vld [vmem:[#allocation2 + $0x8] sm:$0xff]  ;;  %p211_p0 = pnand %p210_p13, %p204_p10 }
  0x26   :  { %95 = vadd.xlane.f32.xlu0 %v94_v5 }
  0xa7   :  { %v66_v6 = vpop.xlane.xlu0 %65 }
  0xa8   :  { %v70_v7 = vsub.f32 %v59_v0, %v66_v6 }
  0xaa   :  { %v72_v8 = vmul.f32 1.442695, %v70_v7  ;;  %v86_v9 = vmul.f32 %v70_v7, %v61_v4 }
  0xab   :  { %v69_v10 = vpop.xlane.xlu0 %68 }
  0xac   :  { %155 = vpow2.f32 %v72_v8  ;;  %v71_v11 = vsub.f32 %v60_v1, %v69_v10  ;;  %v88_v12 = vsel %vm63_vm0, %v86_v9, 0.0 }
  0xad   :  { %89 = vadd.xlane.f32.xlu0 %v88_v12 }
  0xae   :  { %v74_v13 = vmul.f32 1.442695, %v71_v11  ;;  %v87_v21 = vmul.f32 %v71_v11, %v62_v19 }
  0xaf   :  { %v96_v25 = vpop.xlane.xlu0 %95 }
  0xb0   :  { %157 = vpow2.f32 %v74_v13  ;;  %v91_v22 = vsel %vm63_vm0, %v87_v21, 0.0 }
  0xb9   :  { %v156_v15 = vpop.eup %155 }
  0xba   :  { %v76_v16 = vsel %vm63_vm0, %v156_v15, 0.0 }
  0xbb   :  { %77 = vadd.xlane.f32.xlu1 %v76_v16 }
  0xbd   :  { %v158_v17 = vpop.eup %157 }
  0xbe   :  { %v79_v18 = vsel %vm63_vm0, %v158_v17, 0.0 }
  0xbf   :  { %80 = vadd.xlane.f32.xlu1 %v79_v18 }
  0xc3   :  { %98 = vadd.xlane.f32.xlu1 %v97_v20 }
  0xc7   :  { %92 = vadd.xlane.f32.xlu1 %v91_v22 }
 0x136   :  { %v90_v31 = vpop.xlane.xlu0 %89 }
 0x144   :  { %v78_v23 = vpop.xlane.xlu1 %77 }
 0x145   :  { %159 = vlog2.f32 %v78_v23 }
 0x148   :  { %v81_v24 = vpop.xlane.xlu1 %80 }
 0x149   :  { %161 = vlog2.f32 %v81_v24 }
 0x14c   :  { %v99_v28 = vpop.xlane.xlu1 %98 }
 0x150   :  { %v93_v37 = vpop.xlane.xlu1 %92 }
 0x152   :  { %v160_v26 = vpop.eup %159 }
 0x153   :  { %v83_v27 = vmul.f32 0.6931472, %v160_v26 }
 0x155   :  { %v102_v29 = vmul.f32 %v96_v25, %v83_v27 }
 0x156   :  { %v162_v30 = vpop.eup %161 }
 0x157   :  { %v104_v33 = vsub.f32 %v90_v31, %v102_v29  ;;  %v85_v34 = vmul.f32 0.6931472, %v162_v30 }
 0x159   :  { %v106_v35 = vadd.f32 %v104_v33, %v100_v32  ;;  %v103_v36 = vmul.f32 %v99_v28, %v85_v34 }
 0x15b   :  { %109 = vst.msk [vmem:[#allocation2] sm:$0xff] %vm56_vm1, %v106_v35  ;;  %v105_v39 = vsub.f32 %v93_v37, %v103_v36 }
 0x15d   :  { %v107_v40 = vadd.f32 %v105_v39, %v101_v38 }
 0x15f   :  { %110 = vst.msk [vmem:[#allocation2 + $0x8] sm:$0xff] %vm56_vm1, %v107_v40 }
 0x162   :  { %v114_v41 = vld [vmem:[#allocation2] sm:$0xff] }
 0x163   :  { %v116_v43 = vsel %vm56_vm1, %v114_v41, 0.0 }
 0x166   :  { %v115_v42 = vld [vmem:[#allocation2 + $0x8] sm:$0xff] }
 0x167   :  { %v117_v44 = vsel %vm56_vm1, %v115_v42, 0.0 }
 0x168   :  { %v118_v45 = vadd.f32 %v117_v44, %v116_v43 }
 0x16a   :  { %119 = vadd.xlane.f32.xlu0 %v118_v45 }
 0x1f3   :  { %v120_v46 = vpop.xlane.xlu0 %119 }
 0x1f4   :  { %v121_v47 = vrot.slane %v120_v46, 4 }
 0x1f6   :  { %v122_v48 = vadd.f32 %v121_v47, %v120_v46 }
 0x1f8   :  { %v123_v49 = vrot.slane %v122_v48, 2 }
 0x1fa   :  { %v124_v50 = vadd.f32 %v123_v49, %v122_v48 }
 0x1fc   :  { %v125_v51 = vrot.slane %v124_v50, 1 }
 0x1fe   :  { %v126_v52 = vadd.f32 %v125_v51, %v124_v50 }
 0x200   :  { %147 = vpush %v126_v52 }
 0x231   :  { %s148_s21 = spop %147 }
 0x232   :  { %v128_v53 = vstv %s148_s21 }
 0x233   :  { %130 = vst.msk [vmem:[#allocation8] sm:$0x1] %vm129_vm2, %v128_v53 }
 0x234   :  { %214 = shalt.err (!%p211_p0)
}
 0x235   :  { %140 = dma.vmem_to_hbm [thread:$0]  %s138_s1, 16, %s275_s2, [#allocation5]  }
 0x236   :  { %227 = dma.done.wait [#allocation5], 16  }
 0x237   :  { %228 = vsyncadd [#allocation5], 4294967280 }
 0x238   :  { %144 = vsyncpa [#allocation4], 1 }
 0x239   :  { %145 = vsyncpa [#allocation7], 1 }
 0x23a   :  { %146 = vsyncpa [#allocation5], 1 }

</bundles_post_ra>
